<compile_context>
chip_gen: v7x
topology: tpu7x:2x2x1
jax: 0.10.0
libtpu: 0.0.40
codegen_flags: <defaults>
</compile_context>

<pallas_src>
import functools

import jax
import jax.numpy as jnp
from jax.experimental import pallas as pl
from jax.experimental.pallas import tpu as pltpu

EPS = 1e-05

# Total VMEM we aim to spend on (double-buffered) input blocks.
_VMEM_INPUT_BUDGET_BYTES = 24 * 1024 * 1024


# --------------------------------------------------------------------------
# Kernels
# --------------------------------------------------------------------------
def _dice_kernel_unit_weight(s_total, w_scalar,
                             pred_ref, true_ref, out_ref, i1_ref, u1_ref):
    """2-input kernel for pixel_weights == scalar (default 1). Blocks are
    (TB, tR, W); grid is (B//TB, n_r) with the reduction axis last."""
    r = pl.program_id(1)

    @pl.when(r == 0)
    def _init():
        i1_ref[...] = jnp.zeros_like(i1_ref)
        u1_ref[...] = jnp.zeros_like(u1_ref)

    p = pred_ref[...].astype(jnp.float32)          # (TB, tR, W)
    t = true_ref[...].astype(jnp.float32)
    i1_ref[...] += jnp.sum(p * t, axis=1)          # (TB, W)
    u1_ref[...] += jnp.sum(p + t, axis=1)          # (TB, W)

    @pl.when(r == pl.num_programs(1) - 1)
    def _finalize():
        i1 = i1_ref[...]
        u1 = u1_ref[...]
        if w_scalar != 1.0:                        # static python branch
            i1 = i1 * w_scalar
            u1 = u1 * w_scalar
        sw = float(w_scalar) * float(s_total)      # compile-time constant
        iou1 = (EPS + i1) / (EPS + u1)
        i2 = sw - u1 + i1
        u2 = 2.0 * sw - u1
        iou2 = (EPS + i2) / (EPS + u2)
        per_inst = 0.5 * (iou1 + iou2)             # (TB, W)
        out_ref[...] = per_inst[None, :, :].astype(out_ref.dtype)


def _dice_kernel_weighted(pred_ref, true_ref, w_ref, out_ref,
                          i1_ref, u1_ref, sw_ref):
    """3-input kernel for dense per-pixel weights."""
    r = pl.program_id(1)

    @pl.when(r == 0)
    def _init():
        i1_ref[...] = jnp.zeros_like(i1_ref)
        u1_ref[...] = jnp.zeros_like(u1_ref)
        sw_ref[...] = jnp.zeros_like(sw_ref)

    p = pred_ref[...].astype(jnp.float32)
    t = true_ref[...].astype(jnp.float32)
    w = w_ref[...].astype(jnp.float32)
    i1_ref[...] += jnp.sum(p * t * w, axis=1)
    u1_ref[...] += jnp.sum((p + t) * w, axis=1)
    sw_ref[...] += jnp.sum(w, axis=1)

    @pl.when(r == pl.num_programs(1) - 1)
    def _finalize():
        i1 = i1_ref[...]
        u1 = u1_ref[...]
        sw = sw_ref[...]
        iou1 = (EPS + i1) / (EPS + u1)
        i2 = sw - u1 + i1
        u2 = 2.0 * sw - u1
        iou2 = (EPS + i2) / (EPS + u2)
        per_inst = 0.5 * (iou1 + iou2)
        out_ref[...] = per_inst[None, :, :].astype(out_ref.dtype)


# --------------------------------------------------------------------------
# Wrapper
# --------------------------------------------------------------------------
def _choose_tiling(B, CH, W, itemsize, n_inputs):
    """Pick (TB, tR, n_r, ch_padded) so that double-buffered input blocks stay
    within the VMEM budget on every TPU generation."""
    per_block_budget = max(_VMEM_INPUT_BUDGET_BYTES // (2 * n_inputs), 64 * 1024)
    budget_elems = max(per_block_budget // itemsize, 8 * max(W, 1))

    if CH * W <= budget_elems:
        # Whole (C*H, W) slab fits: pack several batch elements per step to
        # amortize the per-grid-step overhead.
        t_r = CH
        max_tb = max(1, budget_elems // max(CH * W, 1))
        tb = 1
        for d in range(1, B + 1):
            if B % d == 0 and d <= max_tb:
                tb = d
        ch_padded = CH
    else:
        # Tile the reduction (C*H) axis; pad it with zeros to a multiple of tR
        # (zero rows contribute nothing to I1 / U1 / S_w).
        tb = 1
        t_r = max(8, min(CH, (budget_elems // max(W, 1)) // 8 * 8))
        ch_padded = pl.cdiv(CH, t_r) * t_r
    n_r = ch_padded // t_r
    return tb, t_r, n_r, ch_padded


def _to_3d(x, B, CH, W, ch_padded):
    x = x.reshape(B, CH, W)
    if ch_padded != CH:
        x = jnp.pad(x, ((0, 0), (0, ch_padded - CH), (0, 0)))
    return x


def soft_dice_instance_biclass_coef(y_pred, y_true, pixel_weights=None):
    """Returns the per-instance (B, W) biclass soft-Dice coefficients."""
    B, C, H, W = y_pred.shape
    CH = C * H

    scalar_weight = None
    w_arr = None
    if pixel_weights is None:
        scalar_weight = 1.0
    elif isinstance(pixel_weights, (int, float)):
        scalar_weight = float(pixel_weights)
    else:
        # TODO(synk): traced scalar weights fall back to the dense-weight path.
        w_arr = jnp.broadcast_to(
            jnp.asarray(pixel_weights).astype(y_pred.dtype), y_pred.shape
        )

    n_inputs = 2 if scalar_weight is not None else 3
    itemsize = max(jnp.dtype(y_pred.dtype).itemsize,
                   jnp.dtype(y_true.dtype).itemsize)
    tb, t_r, n_r, ch_padded = _choose_tiling(B, CH, W, itemsize, n_inputs)

    pred3 = _to_3d(y_pred, B, CH, W, ch_padded)
    true3 = _to_3d(y_true, B, CH, W, ch_padded)

    in_spec = pl.BlockSpec((tb, t_r, W), lambda b, r: (b, r, 0))
    out_spec = pl.BlockSpec((1, tb, W), lambda b, r: (b, 0, 0))
    out_shape = jax.ShapeDtypeStruct((B // tb, tb, W), jnp.float32)

    n_scratch = 2 if scalar_weight is not None else 3
    scratch_shapes = [pltpu.VMEM((tb, W), jnp.float32)] * n_scratch

    # Explicit VMEM budget (double-buffered inputs + output block + scratch).
    block_bytes = tb * t_r * W * itemsize
    needed = 2 * n_inputs * block_bytes + 2 * tb * W * 4 + n_scratch * tb * W * 4
    vmem_limit = int(min(max(needed + (8 << 20), 32 << 20), 48 << 20))

    compiler_params = pltpu.CompilerParams(
        dimension_semantics=("parallel", "arbitrary"),
        vmem_limit_bytes=vmem_limit,
    )
    grid = (B // tb, n_r)

    if scalar_weight is not None:
        kernel = functools.partial(
            _dice_kernel_unit_weight, float(CH), float(scalar_weight)
        )
        out = pl.pallas_call(
            kernel,
            out_shape=out_shape,
            grid=grid,
            in_specs=[in_spec, in_spec],
            out_specs=out_spec,
            scratch_shapes=scratch_shapes,
            compiler_params=compiler_params,
        )(pred3, true3)
    else:
        w3 = _to_3d(w_arr, B, CH, W, ch_padded)
        out = pl.pallas_call(
            _dice_kernel_weighted,
            out_shape=out_shape,
            grid=grid,
            in_specs=[in_spec, in_spec, in_spec],
            out_specs=out_spec,
            scratch_shapes=scratch_shapes,
            compiler_params=compiler_params,
        )(pred3, true3, w3)

    return out.reshape(B, W)


def soft_dice_biclass_coef(y_pred, y_true, pixel_weights=None):
    """Pallas equivalent of SoftDiceBiclassCoef.forward."""
    per_instance = soft_dice_instance_biclass_coef(y_pred, y_true, pixel_weights)
    return per_instance.mean()


# --------------------------------------------------------------------------
# Pure-JAX reference + self-test
# --------------------------------------------------------------------------
def _reference(y_pred, y_true, pixel_weights):
    I1 = (y_pred * y_true * pixel_weights).sum(axis=(1, 2))
    U1 = (y_pred * pixel_weights).sum(axis=(1, 2)) + (y_true * pixel_weights).sum(axis=(1, 2))
    IoU1 = (EPS + I1) / (EPS + U1)
    I2 = ((1.0 - y_pred) * (1.0 - y_true) * pixel_weights).sum(axis=(1, 2))
    U2 = ((1.0 - y_pred) * pixel_weights).sum(axis=(1, 2)) + ((1.0 - y_true) * pixel_weights).sum(axis=(1, 2))
    IoU2 = (EPS + I2) / (EPS + U2)
    return ((IoU1 + IoU2) / 2).mean()


if __name__ == "__main__":
    key = jax.random.PRNGKey(0)
    k1, k2, k3 = jax.random.split(key, 3)

    B, C, H, W = 2, 4, 16, 16
    y_pred = jax.nn.sigmoid(jax.random.normal(k1, (B, C, H, W), dtype=jnp.float32))
    y_true = (jax.random.uniform(k2, (B, C, H, W)) > 0.5).astype(jnp.float32)

    # Default-weight path (pixel_weights = 1): no weight tensor is streamed.
    res = jax.block_until_ready(soft_dice_biclass_coef(y_pred, y_true))
    ref = _reference(y_pred, y_true, jnp.ones_like(y_pred))
    assert jnp.allclose(res, ref, atol=1e-5, rtol=1e-5), (res, ref)

    # Dense per-pixel weights path.
    weights = jax.random.uniform(k3, (B, C, H, W), dtype=jnp.float32) + 0.5
    res_w = jax.block_until_ready(soft_dice_biclass_coef(y_pred, y_true, weights))
    ref_w = _reference(y_pred, y_true, weights)
    assert jnp.allclose(res_w, ref_w, atol=1e-5, rtol=1e-5), (res_w, ref_w)

    print("KERNEL_OK")
</pallas_src>

<mosaic_0001>
module attributes {stable_mosaic.version = 11 : i64} {
  func.func @_dice_kernel_unit_weight(%arg0: i32, %arg1: i32, %arg2: memref<2x64x16xf32, #tpu.memory_space<vmem>>, %arg3: memref<2x64x16xf32, #tpu.memory_space<vmem>>, %arg4: memref<1x2x16xf32, #tpu.memory_space<vmem>>, %arg5: memref<2x16xf32, #tpu.memory_space<vmem>>, %arg6: memref<2x16xf32, #tpu.memory_space<vmem>>) attributes {dimension_semantics = [#tpu.dimension_semantics<parallel>, #tpu.dimension_semantics<arbitrary>], iteration_bounds = array<i64: 1, 1>, scalar_prefetch = 0 : i64, scratch_operands = 2 : i64, tpu.core_type = #tpu.core_type<tc>, window_params = [{transform_indices = @transform_0, window_bounds = array<i64: 2, 64, 16>}, {transform_indices = @transform_1, window_bounds = array<i64: 2, 64, 16>}, {transform_indices = @transform_2, window_bounds = array<i64: 1, 2, 16>}]} {
    %c0_i32 = arith.constant 0 : i32
    %0 = arith.cmpi eq, %arg1, %c0_i32 : i32
    %1 = arith.extui %0 : i1 to i32
    %c0_i32_0 = arith.constant 0 : i32
    %2 = arith.cmpi ne, %1, %c0_i32_0 : i32
    scf.if %2 {
      %cst_17 = arith.constant 0.000000e+00 : f32
      %18 = vector.broadcast %cst_17 : f32 to vector<2x16xf32>
      %c0_18 = arith.constant 0 : index
      %c0_19 = arith.constant 0 : index
      %19 = vector.load %arg5[%c0_18, %c0_19] : memref<2x16xf32, #tpu.memory_space<vmem>>, vector<2x16xf32>
      tpu.vector_store %arg5[%c0_18, %c0_19], %18 {strides = array<i32>} : memref<2x16xf32, #tpu.memory_space<vmem>>, vector<2x16xf32>,
      %cst_20 = arith.constant 0.000000e+00 : f32
      %20 = vector.broadcast %cst_20 : f32 to vector<2x16xf32>
      %c0_21 = arith.constant 0 : index
      %c0_22 = arith.constant 0 : index
      %21 = vector.load %arg6[%c0_21, %c0_22] : memref<2x16xf32, #tpu.memory_space<vmem>>, vector<2x16xf32>
      tpu.vector_store %arg6[%c0_21, %c0_22], %20 {strides = array<i32>} : memref<2x16xf32, #tpu.memory_space<vmem>>, vector<2x16xf32>,
    } else {
    }
    %c0 = arith.constant 0 : index
    %c0_1 = arith.constant 0 : index
    %c0_2 = arith.constant 0 : index
    %3 = vector.load %arg2[%c0, %c0_1, %c0_2] : memref<2x64x16xf32, #tpu.memory_space<vmem>>, vector<2x64x16xf32>
    %c0_3 = arith.constant 0 : index
    %c0_4 = arith.constant 0 : index
    %c0_5 = arith.constant 0 : index
    %4 = vector.load %arg3[%c0_3, %c0_4, %c0_5] : memref<2x64x16xf32, #tpu.memory_space<vmem>>, vector<2x64x16xf32>
    %c0_6 = arith.constant 0 : index
    %c0_7 = arith.constant 0 : index
    %5 = vector.load %arg5[%c0_6, %c0_7] : memref<2x16xf32, #tpu.memory_space<vmem>>, vector<2x16xf32>
    %6 = arith.mulf %3, %4 : vector<2x64x16xf32>
    %cst = arith.constant dense<0.000000e+00> : vector<2x16xf32>
    %7 = vector.multi_reduction <add>, %6, %cst [1] : vector<2x64x16xf32> to vector<2x16xf32>
    %8 = arith.addf %5, %7 : vector<2x16xf32>
    %c0_8 = arith.constant 0 : index
    %c0_9 = arith.constant 0 : index
    %9 = vector.load %arg5[%c0_8, %c0_9] : memref<2x16xf32, #tpu.memory_space<vmem>>, vector<2x16xf32>
    tpu.vector_store %arg5[%c0_8, %c0_9], %8 {strides = array<i32>} : memref<2x16xf32, #tpu.memory_space<vmem>>, vector<2x16xf32>,
    %c0_10 = arith.constant 0 : index
    %c0_11 = arith.constant 0 : index
    %10 = vector.load %arg6[%c0_10, %c0_11] : memref<2x16xf32, #tpu.memory_space<vmem>>, vector<2x16xf32>
    %11 = arith.addf %3, %4 : vector<2x64x16xf32>
    %cst_12 = arith.constant dense<0.000000e+00> : vector<2x16xf32>
    %12 = vector.multi_reduction <add>, %11, %cst_12 [1] : vector<2x64x16xf32> to vector<2x16xf32>
    %13 = arith.addf %10, %12 : vector<2x16xf32>
    %c0_13 = arith.constant 0 : index
    %c0_14 = arith.constant 0 : index
    %14 = vector.load %arg6[%c0_13, %c0_14] : memref<2x16xf32, #tpu.memory_space<vmem>>, vector<2x16xf32>
    tpu.vector_store %arg6[%c0_13, %c0_14], %13 {strides = array<i32>} : memref<2x16xf32, #tpu.memory_space<vmem>>, vector<2x16xf32>,
    %c0_i32_15 = arith.constant 0 : i32
    %15 = arith.cmpi eq, %arg1, %c0_i32_15 : i32
    %16 = arith.extui %15 : i1 to i32
    %c0_i32_16 = arith.constant 0 : i32
    %17 = arith.cmpi ne, %16, %c0_i32_16 : i32
    scf.if %17 {
      %c0_17 = arith.constant 0 : index
      %c0_18 = arith.constant 0 : index
      %18 = vector.load %arg5[%c0_17, %c0_18] : memref<2x16xf32, #tpu.memory_space<vmem>>, vector<2x16xf32>
      %c0_19 = arith.constant 0 : index
      %c0_20 = arith.constant 0 : index
      %19 = vector.load %arg6[%c0_19, %c0_20] : memref<2x16xf32, #tpu.memory_space<vmem>>, vector<2x16xf32>
      %cst_21 = arith.constant 9.99999974E-6 : f32
      %20 = vector.broadcast %cst_21 : f32 to vector<2x16xf32>
      %21 = arith.addf %20, %18 : vector<2x16xf32>
      %cst_22 = arith.constant 9.99999974E-6 : f32
      %22 = vector.broadcast %cst_22 : f32 to vector<2x16xf32>
      %23 = arith.addf %22, %19 : vector<2x16xf32>
      %24 = arith.divf %21, %23 : vector<2x16xf32>
      %cst_23 = arith.constant 6.400000e+01 : f32
      %25 = vector.broadcast %cst_23 : f32 to vector<2x16xf32>
      %26 = arith.subf %25, %19 : vector<2x16xf32>
      %27 = arith.addf %26, %18 : vector<2x16xf32>
      %cst_24 = arith.constant 1.280000e+02 : f32
      %28 = vector.broadcast %cst_24 : f32 to vector<2x16xf32>
      %29 = arith.subf %28, %19 : vector<2x16xf32>
      %cst_25 = arith.constant 9.99999974E-6 : f32
      %30 = vector.broadcast %cst_25 : f32 to vector<2x16xf32>
      %31 = arith.addf %30, %27 : vector<2x16xf32>
      %cst_26 = arith.constant 9.99999974E-6 : f32
      %32 = vector.broadcast %cst_26 : f32 to vector<2x16xf32>
      %33 = arith.addf %32, %29 : vector<2x16xf32>
      %34 = arith.divf %31, %33 : vector<2x16xf32>
      %35 = arith.addf %24, %34 : vector<2x16xf32>
      %cst_27 = arith.constant 5.000000e-01 : f32
      %36 = vector.broadcast %cst_27 : f32 to vector<2x16xf32>
      %37 = arith.mulf %36, %35 : vector<2x16xf32>
      %38 = vector.shape_cast %37 : vector<2x16xf32> to vector<1x2x16xf32>
      %c0_28 = arith.constant 0 : index
      %c0_29 = arith.constant 0 : index
      %c0_30 = arith.constant 0 : index
      %39 = vector.load %arg4[%c0_28, %c0_29, %c0_30] : memref<1x2x16xf32, #tpu.memory_space<vmem>>, vector<1x2x16xf32>
      tpu.vector_store %arg4[%c0_28, %c0_29, %c0_30], %38 {strides = array<i32>} : memref<1x2x16xf32, #tpu.memory_space<vmem>>, vector<1x2x16xf32>,
    } else {
    }
    return
  }
  func.func @transform_0(%arg0: i32, %arg1: i32) -> (i32, i32, i32) {
    %c0_i32 = arith.constant 0 : i32
    %c0_i32_0 = arith.constant 0 : i32
    return %arg0, %arg1, %c0_i32 : i32, i32, i32
  }
  func.func @transform_1(%arg0: i32, %arg1: i32) -> (i32, i32, i32) {
    %c0_i32 = arith.constant 0 : i32
    %c0_i32_0 = arith.constant 0 : i32
    return %arg0, %arg1, %c0_i32 : i32, i32, i32
  }
  func.func @transform_2(%arg0: i32, %arg1: i32) -> (i32, i32, i32) {
    %c0_i32 = arith.constant 0 : i32
    %c0_i32_0 = arith.constant 0 : i32
    %c0_i32_1 = arith.constant 0 : i32
    return %arg0, %c0_i32, %c0_i32_0 : i32, i32, i32
  }
}

</mosaic_0001>

<bundles_post_ra>
// kernel: tpu_custom_call.1
= control target key start
LH: loop header
LB: loop body
LE: loop exit
PB: predicated region body
PF: predicated region fallthrough
CT: control target
= control target key end

     0   :  { %vm16_vm0 = vcmask 123904   ;;  %v247_v0 = vmov 0.0   ;;  %vm68_vm1 = vcmask 130048   ;;  %s487_s0 = inlined_call_operand.vmem [shape: f32[2,64,16], index: 0, kind: input, shape index: {}]   ;;  %s488_s1 = inlined_call_operand.vmem [shape: f32[2,64,16], index: 1, kind: input, shape index: {}]   ;;  %s489_s2 = inlined_call_operand.hbm [shape: f32[1,2,16], index: 2, kind: output, shape index: {}]  }
   0x1   :  { %18 = vst.msk [vmem:[#allocation3] sm:$0x3] %vm16_vm0, %v247_v0  ;;  %17 = vst.msk [vmem:[#allocation2] sm:$0x3] %vm16_vm0, %v247_v0  ;;  %v19_v1 = vld [vmem:[%s487_s0] sm:$0xff]  ;;  %v272_v2 = vld [vmem:[%s487_s0 + $0x8] sm:$0xff] }
   0x2   :  { %v277_v3 = vld [vmem:[%s487_s0 + $0x10] sm:$0xff]  ;;  %v282_v4 = vld [vmem:[%s487_s0 + $0x18] sm:$0xff]  ;;  %v287_v5 = vld [vmem:[%s487_s0 + $0x20] sm:$0xff] }
   0x3   :  { %v292_v6 = vld [vmem:[%s487_s0 + $0x40] sm:$0xff]  ;;  %v297_v7 = vld [vmem:[%s487_s0 + $0x48] sm:$0xff]  ;;  %v307_v9 = vld [vmem:[%s487_s0 + $0x30] sm:$0xff] }
   0x4   :  { %v302_v8 = vld [vmem:[%s487_s0 + $0x28] sm:$0xff]  ;;  %v312_v10 = vld [vmem:[%s487_s0 + $0x38] sm:$0xff]  ;;  %v317_v11 = vld [vmem:[%s487_s0 + $0x50] sm:$0xff] }
   0x5   :  { %v35_v12 = vld [vmem:[%s488_s1] sm:$0xff]  ;;  %v36_v13 = vld [vmem:[%s488_s1 + $0x8] sm:$0xff]  ;;  %v328_v14 = vld [vmem:[%s487_s0 + $0x58] sm:$0xff] }
   0x6   :  { %v333_v15 = vld [vmem:[%s487_s0 + $0x60] sm:$0xff]  ;;  %v37_v16 = vld [vmem:[%s488_s1 + $0x10] sm:$0xff]  ;;  %v38_v17 = vld [vmem:[%s488_s1 + $0x18] sm:$0xff]  ;;  %v120_v19 = vadd.f32 %v35_v12, %v19_v1  ;;  %v121_v20 = vadd.f32 %v36_v13, %v272_v2 }
   0x7   :  { %v39_v18 = vld [vmem:[%s488_s1 + $0x20] sm:$0xff]  ;;  %v348_v21 = vld [vmem:[%s487_s0 + $0x68] sm:$0xff]  ;;  %v353_v22 = vld [vmem:[%s487_s0 + $0x70] sm:$0xff]  ;;  %v122_v27 = vadd.f32 %v37_v16, %v277_v3  ;;  %v123_v28 = vadd.f32 %v38_v17, %v282_v4 }
   0x8   :  { %v358_v23 = vld [vmem:[%s487_s0 + $0x78] sm:$0xff]  ;;  %v40_v24 = vld [vmem:[%s488_s1 + $0x28] sm:$0xff]  ;;  %v41_v25 = vld [vmem:[%s488_s1 + $0x30] sm:$0xff]  ;;  %v124_v32 = vadd.f32 %v39_v18, %v287_v5  ;;  %v136_v33 = vsel %vm68_vm1, %v120_v19, 0.0  ;;  %v137_v40 = vsel %vm68_vm1, %v121_v20, 0.0 }
   0x9   :  { %v369_v26 = vld [vmem:[%s488_s1 + $0x38] sm:$0xff]  ;;  %v43_v29 = vld [vmem:[%s488_s1 + $0x40] sm:$0xff]  ;;  %v44_v30 = vld [vmem:[%s488_s1 + $0x48] sm:$0xff]  ;;  %v125_v43 = vadd.f32 %v40_v24, %v302_v8  ;;  %v126_v44 = vadd.f32 %v41_v25, %v307_v9  ;;  %v138_v46 = vadd.f32 %v137_v40, %v136_v33  ;;  %v139_v49 = vsel %vm68_vm1, %v122_v27, 0.0 }
   0xa   :  { %v45_v31 = vld [vmem:[%s488_s1 + $0x50] sm:$0xff]  ;;  %v46_v34 = vld [vmem:[%s488_s1 + $0x58] sm:$0xff]  ;;  %v47_v35 = vld [vmem:[%s488_s1 + $0x60] sm:$0xff]  ;;  %v128_v37 = vadd.f32 %v43_v29, %v292_v6  ;;  %v129_v38 = vadd.f32 %v44_v30, %v297_v7  ;;  %v127_v45 = vadd.f32 %v369_v26, %v312_v10  ;;  %v141_v50 = vsel %vm68_vm1, %v123_v28, 0.0 }
   0xb   :  { %v393_v36 = vld [vmem:[%s488_s1 + $0x68] sm:$0xff]  ;;  %v130_v39 = vadd.f32 %v45_v31, %v317_v11  ;;  %v402_v41 = vld [vmem:[%s488_s1 + $0x70] sm:$0xff]  ;;  %v407_v42 = vld [vmem:[%s488_s1 + $0x78] sm:$0xff]  ;;  %v131_v47 = vadd.f32 %v46_v34, %v328_v14  ;;  %v132_v48 = vadd.f32 %v47_v35, %v333_v15 }
   0xc   :  { %7 = vsyncpa [#allocation5], 0  ;;  %v133_v51 = vadd.f32 %v393_v36, %v348_v21  ;;  %v134_v52 = vadd.f32 %v402_v41, %v353_v22  ;;  %v135_v53 = vadd.f32 %v407_v42, %v358_v23  ;;  %v140_v54 = vadd.f32 %v139_v49, %v138_v46  ;;  %s248_s1 = smov [#allocation4]  }
   0xd   :  { %v143_v55 = vsel %vm68_vm1, %v124_v32, 0.0  ;;  %v157_v56 = vsel %vm68_vm1, %v128_v37, 0.0  ;;  %v158_v57 = vsel %vm68_vm1, %v129_v38, 0.0  ;;  %v160_v58 = vsel %vm68_vm1, %v130_v39, 0.0  ;;  %s209_s16 = sshll.u32 %s248_s1, 4  ;;  %s210_s16 = int_to_ptr.vmem [resolvable:$true] %s209_s16 }
   0xe   :  { %v142_v59 = vadd.f32 %v141_v50, %v140_v54  ;;  %v159_v60 = vadd.f32 %v158_v57, %v157_v56  ;;  %v52_v61 = vmul.f32 %v35_v12, %v19_v1  ;;  %v145_v62 = vsel %vm68_vm1, %v125_v43, 0.0  ;;  %s223_s17 = scalar_lea.vmem %s210_s16, 32  ;;  %p228_p1 = scmp.lt.s32.totalorder %s210_s16, %s210_s16 }
   0xf   :  { %v162_v63 = vsel %vm68_vm1, %v131_v47, 0.0  ;;  %v53_v0 = vmul.f32 %v36_v13, %v272_v2  ;;  %v54_v19 = vmul.f32 %v37_v16, %v277_v3  ;;  %v147_v27 = vsel %vm68_vm1, %v126_v44, 0.0  ;;  %p224_p0 = scmp.ne.s32.totalorder %s210_s16, %s223_s17  ;;  %p229_p2 = scmp.lt.s32.totalorder %s223_s17, %s223_s17 }
  0x10   :  { %v144_v20 = vadd.f32 %v143_v55, %v142_v59  ;;  %v149_v28 = vsel %vm68_vm1, %v127_v45, 0.0  ;;  %v161_v32 = vadd.f32 %v160_v58, %v159_v60  ;;  %v164_v33 = vsel %vm68_vm1, %v132_v48, 0.0 }
  0x11   :  { %v166_v37 = vsel %vm68_vm1, %v133_v51, 0.0  ;;  %v168_v1 = vsel %vm68_vm1, %v134_v52, 0.0  ;;  %v170_v12 = vsel %vm68_vm1, %v135_v53, 0.0  ;;  %v55_v2 = vmul.f32 %v38_v17, %v282_v4  ;;  %p230_p3 = por %p229_p2, %p228_p1 }
  0x12   :  { %v146_v38 = vadd.f32 %v145_v62, %v144_v20  ;;  %v163_v39 = vadd.f32 %v162_v63, %v161_v32  ;;  %v56_v3 = vmul.f32 %v39_v18, %v287_v5  ;;  %v57_v13 = vmul.f32 %v40_v24, %v302_v8 }
  0x13   :  { %v60_v16 = vmul.f32 %v43_v29, %v292_v6  ;;  %v61_v40 = vmul.f32 %v44_v30, %v297_v7  ;;  %v62_v43 = vmul.f32 %v45_v31, %v317_v11  ;;  %v69_v46 = vsel %vm68_vm1, %v52_v61, 0.0  ;;  %p231_p4 = pnand %p230_p3, %p224_p0 }
  0x14   :  { %v148_v44 = vadd.f32 %v147_v27, %v146_v38  ;;  %v165_v45 = vadd.f32 %v164_v33, %v163_v39  ;;  %v70_v47 = vsel %vm68_vm1, %v53_v0, 0.0  ;;  %v58_v48 = vmul.f32 %v41_v25, %v307_v9  ;;  %v119_v38 = vld [vmem:[#allocation3] sm:$0x3] }
  0x15   :  { %v63_v4 = vmul.f32 %v46_v34, %v328_v14  ;;  %v71_v17 = vadd.f32 %v70_v47, %v69_v46  ;;  %v72_v5 = vsel %vm68_vm1, %v54_v19, 0.0  ;;  %v64_v6 = vmul.f32 %v47_v35, %v333_v15 }
  0x16   :  { %v150_v8 = vadd.f32 %v149_v28, %v148_v44  ;;  %v167_v18 = vadd.f32 %v166_v37, %v165_v45  ;;  %v74_v7 = vsel %vm68_vm1, %v55_v2, 0.0  ;;  %v76_v24 = vsel %vm68_vm1, %v56_v3, 0.0 }
  0x17   :  { %v73_v11 = vadd.f32 %v72_v5, %v71_v17  ;;  %v90_v29 = vsel %vm68_vm1, %v60_v16, 0.0  ;;  %v91_v30 = vsel %vm68_vm1, %v61_v40, 0.0  ;;  %v93_v14 = vsel %vm68_vm1, %v62_v43, 0.0 }
  0x18   :  { %v151_v31 = vrot.slane %v150_v8, 4  ;;  %v169_v9 = vadd.f32 %v168_v1, %v167_v18  ;;  %v92_v25 = vadd.f32 %v91_v30, %v90_v29  ;;  %v59_v34 = vmul.f32 %v369_v26, %v312_v10 }
  0x19   :  { %v65_v15 = vmul.f32 %v393_v36, %v348_v21  ;;  %v75_v35 = vadd.f32 %v74_v7, %v73_v11  ;;  %v95_v49 = vsel %vm68_vm1, %v63_v4, 0.0  ;;  %v78_v52 = vsel %vm68_vm1, %v57_v13, 0.0  ;;  %v51_v4 = vld [vmem:[#allocation2] sm:$0x3] }
  0x1a   :  { %v152_v50 = vadd.f32 %v151_v31, %v150_v8  ;;  %v171_v51 = vadd.f32 %v170_v12, %v169_v9  ;;  %v94_v53 = vadd.f32 %v93_v14, %v92_v25  ;;  %v66_v54 = vmul.f32 %v402_v41, %v353_v22 }
  0x1b   :  { %v77_v55 = vadd.f32 %v76_v24, %v75_v35  ;;  %v97_v56 = vsel %vm68_vm1, %v64_v6, 0.0  ;;  %v80_v10 = vsel %vm68_vm1, %v58_v48, 0.0  ;;  %v67_v21 = vmul.f32 %v407_v42, %v358_v23 }
  0x1c   :  { %v153_v57 = vrot.slane %v152_v50, 2  ;;  %v172_v58 = vrot.slane %v171_v51, 4  ;;  %v96_v26 = vadd.f32 %v95_v49, %v94_v53  ;;  %v99_v59 = vsel %vm68_vm1, %v65_v15, 0.0 }
  0x1d   :  { %v79_v36 = vadd.f32 %v78_v52, %v77_v55  ;;  %v82_v62 = vsel %vm68_vm1, %v59_v34, 0.0  ;;  %v101_v41 = vsel %vm68_vm1, %v66_v54, 0.0  ;;  %v103_v28 = vsel %vm68_vm1, %v67_v21, 0.0 }
  0x1e   :  { %v154_v60 = vadd.f32 %v153_v57, %v152_v50  ;;  %v173_v61 = vadd.f32 %v172_v58, %v171_v51  ;;  %v98_v63 = vadd.f32 %v97_v56, %v96_v26  ;;  %vm113_vm2 = vcmask 1041409  }
  0x1f   :  { %v81_v22 = vadd.f32 %v80_v10, %v79_v36 }
  0x20   :  { %v155_v0 = vrot.slane %v154_v60, 1  ;;  %v174_v19 = vrot.slane %v173_v61, 2  ;;  %v100_v20 = vadd.f32 %v99_v59, %v98_v63 }
  0x21   :  { %v83_v27 = vadd.f32 %v82_v62, %v81_v22 }
  0x22   :  { %v175_v32 = vadd.f32 %v174_v19, %v173_v61  ;;  %v102_v33 = vadd.f32 %v101_v41, %v100_v20  ;;  %v156_v42 = vadd.f32 %v155_v0, %v154_v60 }
  0x23   :  { %v84_v23 = vrot.slane %v83_v27, 4 }
  0x24   :  { %v176_v37 = vrot.slane %v175_v32, 1  ;;  %v104_v1 = vadd.f32 %v103_v28, %v102_v33 }
  0x25   :  { %v85_v12 = vadd.f32 %v84_v23, %v83_v27 }
  0x26   :  { %v177_v39 = vadd.f32 %v176_v37, %v175_v32  ;;  %v105_v2 = vrot.slane %v104_v1, 4 }
  0x27   :  { %v86_v3 = vrot.slane %v85_v12, 2 }
  0x28   :  { %v180_v13 = vsel %vm113_vm2, %v177_v39, %v156_v42  ;;  %v106_v16 = vadd.f32 %v105_v2, %v104_v1 }
  0x29   :  { %v182_v40 = vadd.f32 %v180_v13, %v119_v38  ;;  %v87_v43 = vadd.f32 %v86_v3, %v85_v12 }
  0x2a   :  { %v107_v44 = vrot.slane %v106_v16, 2 }
  0x2b   :  { %183 = vst.msk [vmem:[#allocation3] sm:$0x3] %vm16_vm0, %v182_v40  ;;  %v88_v45 = vrot.slane %v87_v43, 1 }
  0x2c   :  { %v108_v46 = vadd.f32 %v107_v44, %v106_v16 }
  0x2d   :  { %v89_v47 = vadd.f32 %v88_v45, %v87_v43 }
  0x2e   :  { %v109_v48 = vrot.slane %v108_v46, 1 }
  0x30   :  { %v110_v17 = vadd.f32 %v109_v48, %v108_v46 }
  0x32   :  { %v114_v5 = vsel %vm113_vm2, %v110_v17, %v89_v47  ;;  %v188_v8 = vld [vmem:[#allocation3] sm:$0x3] }
  0x33   :  { %v116_v18 = vadd.f32 %v114_v5, %v51_v4  ;;  %v190_v6 = vadd.f32 1e-05, %v188_v8  ;;  %v195_v7 = vsub.f32 128.0, %v188_v8  ;;  %v193_v24 = vsub.f32 64.0, %v188_v8 }
  0x35   :  { %118 = vst.msk [vmem:[#allocation2] sm:$0x3] %vm16_vm0, %v116_v18  ;;  %219 = vrcp.f32 %v190_v6  ;;  %v197_v11 = vadd.f32 1e-05, %v195_v7 }
  0x37   :  { %221 = vrcp.f32 %v197_v11 }
  0x3c   :  { %v187_v29 = vld [vmem:[#allocation2] sm:$0x3] }
  0x3d   :  { %v194_v30 = vadd.f32 %v193_v24, %v187_v29  ;;  %v189_v31 = vadd.f32 1e-05, %v187_v29 }
  0x3f   :  { %v220_v9 = vpop.eup %219  ;;  %v196_v25 = vadd.f32 1e-05, %v194_v30 }
  0x40   :  { %v192_v34 = vmul.f32 %v220_v9, %v189_v31 }
  0x41   :  { %v222_v14 = vpop.eup %221 }
  0x42   :  { %v199_v15 = vmul.f32 %v222_v14, %v196_v25 }
  0x44   :  { %v200_v35 = vadd.f32 %v199_v15, %v192_v34 }
  0x46   :  { %v201_v49 = vmul.f32 0.5, %v200_v35 }
  0x48   :  { %202 = vst.msk [vmem:[#allocation4] sm:$0x3] %vm16_vm0, %v201_v49 }
  0x49   :  { %234 = shalt.err (!%p231_p4)
}
  0x4a   :  { %s235_s20 = scalar_lea.hbm %s489_s2, 32 }
  0x4b   :  { %p236_p5 = scmp.ne.s32.totalorder %s489_s2, %s235_s20  ;;  %p239_p6 = scmp.lt.u32.totalorder %s235_s20, %s489_s2 }
  0x4d   :  { %p241_p7 = pnand %p239_p6, %p236_p5 }
  0x4f   :  { %244 = shalt.err (!%p241_p7)
}
  0x50   :  { %212 = dma.vmem_to_hbm [thread:$0]  %s210_s16, 32, %s489_s2, [#allocation5]  }
  0x51   :  { %245 = dma.done.wait [#allocation5], 32  }
  0x52   :  { %246 = vsyncadd [#allocation5], 4294967264 }
  0x53   :  { %216 = vsyncpa [#allocation5], 1 }

</bundles_post_ra>
